<compile_context>
chip_gen: v7x
topology: tpu7x:2x2x1
jax: 0.10.0
libtpu: 0.0.40
codegen_flags: <defaults>
</compile_context>

<pallas_src>
import jax
import jax.numpy as jnp
from jax.experimental import pallas as pl
from jax.experimental.pallas import tpu as pltpu


# ----------------------------------------------------------------------------
# Fused kernel: conv-as-matmul (tap accumulation) + relu + label attention
#               (softmax over L', exact divide) + content matmul + tanh(Linear)
# ----------------------------------------------------------------------------
def atten_cnn_kernel(emb_ref, wc_ref, bc_ref, g_ref, wf_ref, bf_ref, out_ref):
    B, L, E = emb_ref.shape
    ksz = wc_ref.shape[0]
    K = wc_ref.shape[2]
    N = g_ref.shape[0]
    twoE = wf_ref.shape[1]
    Lp = L - ksz + 1
    f32 = jnp.float32

    bc = bc_ref[...]                                        # (1, K)   conv bias
    gn = jnp.broadcast_to(g_ref[...], (B, N, K))            # (B, N, K) g_node_feat (natural layout)
    wf = jnp.broadcast_to(wf_ref[...], (B, K, twoE))        # (B, K, 2E) content_final weight^T
    bf = bf_ref[...]                                        # (1, 2E)  content_final bias

    # ---- Conv2d(1, K, (ksz, E)) + ReLU, im2col-free: accumulate over the taps.
    conv = jnp.zeros((B, Lp, K), f32)
    for k in range(ksz):                                    # ksz is small & static -> unrolled
        x_k = emb_ref[:, k:k + Lp, :]                       # (B, L', E) shifted window
        w_k = jnp.broadcast_to(wc_ref[k], (B, E, K))        # (B, E, K)  tap weight
        conv = conv + jnp.einsum("ble,bek->blk", x_k, w_k, preferred_element_type=f32)
    conv = jnp.maximum(conv + bc, 0.0)                      # (B, L', K) == abstract_conv^T

    # ---- label-wise attention scores (B, N, L'); softmax over L' (exact divide).
    scores = jnp.einsum("bnk,blk->bnl", gn, conv, preferred_element_type=f32)
    m = jnp.max(scores, axis=-1, keepdims=True)
    ex = jnp.exp(scores - m)
    atten = ex / jnp.sum(ex, axis=-1, keepdims=True)        # (B, N, L')

    # ---- content^T = atten @ conv  (== torch abstract_content.transpose(1,2))
    content_t = jnp.einsum("bnl,blk->bnk", atten, conv, preferred_element_type=f32)   # (B, N, K)

    # ---- content_final Linear + tanh
    feat = jnp.einsum("bnk,bkf->bnf", content_t, wf, preferred_element_type=f32) + bf  # (B, N, 2E)
    out_ref[...] = jnp.tanh(feat)


# ----------------------------------------------------------------------------
# One-time parameter/layout preparation (hoisted off the forward path).
# ----------------------------------------------------------------------------
def prepare_params(embedding, conv_weight, conv_bias, fc_weight, fc_bias, g_node_feat):
    K, one, ksz, E = conv_weight.shape
    assert one == 1, "Conv2d input channels must be 1"
    twoE = fc_weight.shape[0]
    return {
        "embedding": embedding.astype(jnp.float32),                              # (V, E)
        "wc": jnp.transpose(conv_weight[:, 0], (1, 2, 0)).astype(jnp.float32),   # (ksz, E, K)
        "bc": conv_bias.reshape(1, K).astype(jnp.float32),                       # (1, K)
        "g_node_feat": g_node_feat.astype(jnp.float32),                          # (N, E) natural layout
        "wf": jnp.transpose(fc_weight).astype(jnp.float32),                      # (K, 2E)
        "bf": fc_bias.reshape(1, twoE).astype(jnp.float32),                      # (1, 2E)
    }


def atten_cnn_forward(params, input_seq):
    # TODO(synk): embedding gather stays in plain JAX (data-dependent gather); at larger
    #             sizes it could be fused via scalar prefetch + an Element index_map.
    # TODO(synk): nn.Dropout(atten_dropout) is eval-mode identity here (no train-mode dropout).
    emb = jnp.take(params["embedding"], input_seq, axis=0)                       # (B, L, E)
    B, L, E = emb.shape
    ksz, E_w, K = params["wc"].shape
    N, K_g = params["g_node_feat"].shape
    twoE = params["wf"].shape[1]
    assert E_w == E, "conv kernel width must equal embedding_dim"
    assert K == E and K_g == K, "nKernel must equal embedding_dim for the attention matmul"
    assert L >= ksz, "sequence shorter than conv kernel size"
    Lp = L - ksz + 1

    flops = 2 * B * Lp * (ksz * E * K + 2 * K * N) + 2 * B * N * K * twoE
    transcendentals = B * N * Lp + B * N * twoE                                  # exp + tanh
    nbytes = 4 * (emb.size + params["wc"].size + params["bc"].size
                  + params["g_node_feat"].size + params["wf"].size
                  + params["bf"].size + B * N * twoE)

    vmem = lambda: pl.BlockSpec(memory_space=pltpu.MemorySpace.VMEM)
    return pl.pallas_call(
        atten_cnn_kernel,
        out_shape=jax.ShapeDtypeStruct((B, N, twoE), jnp.float32),
        in_specs=[vmem() for _ in range(6)],
        out_specs=vmem(),
        compiler_params=pltpu.CompilerParams(vmem_limit_bytes=64 * 1024 * 1024),
        cost_estimate=pl.CostEstimate(flops=flops, transcendentals=transcendentals,
                                      bytes_accessed=nbytes),
    )(emb, params["wc"], params["bc"], params["g_node_feat"], params["wf"], params["bf"])


# ----------------------------------------------------------------------------
# Pure-JAX reference (mirrors the PyTorch forward, high-precision matmuls).
# ----------------------------------------------------------------------------
def atten_cnn_reference(embedding, conv_weight, conv_bias, fc_weight, fc_bias,
                        input_seq, g_node_feat):
    hi = jax.lax.Precision.HIGHEST
    emb = jnp.take(embedding, input_seq, axis=0)                                  # (B, L, E)
    B, L, E = emb.shape
    K, _, ksz, _ = conv_weight.shape
    Lp = L - ksz + 1
    windows = jnp.stack([emb[:, t:t + ksz, :] for t in range(Lp)], axis=1)        # (B, L', ksz, E)
    conv = jnp.einsum("blse,kse->bkl", windows, conv_weight[:, 0], precision=hi)
    conv = jnp.maximum(conv + conv_bias[None, :, None], 0.0)                      # (B, K, L')
    scores = jnp.einsum("bkl,nk->bln", conv, g_node_feat, precision=hi)           # (B, L', N)
    atten = jax.nn.softmax(scores, axis=1)                                        # softmax over L'
    content = jnp.einsum("bkl,bln->bkn", conv, atten, precision=hi)               # (B, K, N)
    feat = jnp.einsum("bkn,fk->bnf", content, fc_weight, precision=hi) + fc_bias  # (B, N, 2E)
    return jnp.tanh(feat)


if __name__ == "__main__":
    # Small shapes consistent with the module (nKernel == embedding_dim).
    vocab_size = 50
    E = 16          # embedding_dim
    K = E           # nKernel
    ksz = 3
    L = 16          # sequence length
    B = 2           # batch
    N = 8           # number of label/graph nodes
    twoE = 2 * E

    key = jax.random.PRNGKey(0)
    ks = jax.random.split(key, 7)

    embedding = 0.5 * jax.random.normal(ks[0], (vocab_size, E), jnp.float32)
    conv_weight = 0.1 * jax.random.normal(ks[1], (K, 1, ksz, E), jnp.float32)     # torch Conv2d layout
    conv_bias = 0.1 * jax.random.normal(ks[2], (K,), jnp.float32)
    fc_weight = 0.1 * jax.random.normal(ks[3], (twoE, K), jnp.float32)            # torch Linear (out, in)
    fc_bias = jnp.zeros((twoE,), jnp.float32)
    g_node_feat = 0.5 * jax.random.normal(ks[4], (N, E), jnp.float32)
    input_seq = jax.random.randint(ks[5], (B, L), 0, vocab_size, dtype=jnp.int32)

    params = prepare_params(embedding, conv_weight, conv_bias, fc_weight, fc_bias, g_node_feat)

    out = atten_cnn_forward(params, input_seq)
    out = jax.block_until_ready(out)

    ref = atten_cnn_reference(embedding, conv_weight, conv_bias, fc_weight, fc_bias,
                              input_seq, g_node_feat)

    assert out.shape == (B, N, twoE) and out.dtype == jnp.float32
    assert bool(jnp.all(jnp.isfinite(out)))
    err = float(jnp.max(jnp.abs(out - ref)))
    assert err < 5e-3, f"max abs err {err}"
    print("KERNEL_OK")
</pallas_src>

<mosaic_0001>
module attributes {stable_mosaic.version = 11 : i64} {
  func.func @atten_cnn_kernel(%arg0: memref<2x16x16xf32, #tpu.memory_space<vmem>>, %arg1: memref<3x16x16xf32, #tpu.memory_space<vmem>>, %arg2: memref<1x16xf32, #tpu.memory_space<vmem>>, %arg3: memref<8x16xf32, #tpu.memory_space<vmem>>, %arg4: memref<16x32xf32, #tpu.memory_space<vmem>>, %arg5: memref<1x32xf32, #tpu.memory_space<vmem>>, %arg6: memref<2x8x32xf32, #tpu.memory_space<vmem>>) attributes {dimension_semantics = [], scalar_prefetch = 0 : i64, scratch_operands = 0 : i64, tpu.core_type = #tpu.core_type<tc>} {
    %c0 = arith.constant 0 : index
    %c0_0 = arith.constant 0 : index
    %0 = vector.load %arg2[%c0, %c0_0] : memref<1x16xf32, #tpu.memory_space<vmem>>, vector<1x16xf32>
    %c0_1 = arith.constant 0 : index
    %c0_2 = arith.constant 0 : index
    %1 = vector.load %arg3[%c0_1, %c0_2] : memref<8x16xf32, #tpu.memory_space<vmem>>, vector<8x16xf32>
    %2 = vector.shape_cast %1 : vector<8x16xf32> to vector<1x8x16xf32>
    %3 = vector.broadcast %2 : vector<1x8x16xf32> to vector<2x8x16xf32>
    %c0_3 = arith.constant 0 : index
    %c0_4 = arith.constant 0 : index
    %4 = vector.load %arg4[%c0_3, %c0_4] : memref<16x32xf32, #tpu.memory_space<vmem>>, vector<16x32xf32>
    %5 = vector.shape_cast %4 : vector<16x32xf32> to vector<1x16x32xf32>
    %6 = vector.broadcast %5 : vector<1x16x32xf32> to vector<2x16x32xf32>
    %c0_5 = arith.constant 0 : index
    %c0_6 = arith.constant 0 : index
    %7 = vector.load %arg5[%c0_5, %c0_6] : memref<1x32xf32, #tpu.memory_space<vmem>>, vector<1x32xf32>
    %cst = arith.constant 0.000000e+00 : f32
    %8 = vector.broadcast %cst : f32 to vector<2x14x16xf32>
    %c0_7 = arith.constant 0 : index
    %c0_8 = arith.constant 0 : index
    %c0_9 = arith.constant 0 : index
    %9 = vector.load %arg0[%c0_7, %c0_8, %c0_9] : memref<2x16x16xf32, #tpu.memory_space<vmem>>, vector<2x14x16xf32>
    %c0_10 = arith.constant 0 : index
    %c0_11 = arith.constant 0 : index
    %c0_12 = arith.constant 0 : index
    %10 = vector.load %arg1[%c0_10, %c0_11, %c0_12] : memref<3x16x16xf32, #tpu.memory_space<vmem>>, vector<1x16x16xf32>
    %11 = vector.shape_cast %10 : vector<1x16x16xf32> to vector<16x16xf32>
    %12 = vector.shape_cast %11 : vector<16x16xf32> to vector<1x16x16xf32>
    %13 = vector.broadcast %12 : vector<1x16x16xf32> to vector<2x16x16xf32>
    "tpu.trace_start"() <{level = 10 : i32, message = "ble,bek->blk"}> : () -> ()
    %cst_13 = arith.constant dense<0.000000e+00> : vector<2x14x16xf32>
    %14 = tpu.matmul %9, %13, %cst_13 {dimension_numbers = #tpu.dot_dimension_numbers<[2], [1], [1], [2], [0, 0, 0, 1, 1, 2], [0], [0]>} : vector<2x14x16xf32>, vector<2x16x16xf32>, vector<2x14x16xf32> -> vector<2x14x16xf32>
    "tpu.trace_stop"() : () -> ()
    %15 = arith.addf %8, %14 : vector<2x14x16xf32>
    %c0_14 = arith.constant 0 : index
    %c1 = arith.constant 1 : index
    %c0_15 = arith.constant 0 : index
    %16 = vector.load %arg0[%c0_14, %c1, %c0_15] : memref<2x16x16xf32, #tpu.memory_space<vmem>>, vector<2x14x16xf32>
    %c1_16 = arith.constant 1 : index
    %c0_17 = arith.constant 0 : index
    %c0_18 = arith.constant 0 : index
    %17 = vector.load %arg1[%c1_16, %c0_17, %c0_18] : memref<3x16x16xf32, #tpu.memory_space<vmem>>, vector<1x16x16xf32>
    %18 = vector.shape_cast %17 : vector<1x16x16xf32> to vector<16x16xf32>
    %19 = vector.shape_cast %18 : vector<16x16xf32> to vector<1x16x16xf32>
    %20 = vector.broadcast %19 : vector<1x16x16xf32> to vector<2x16x16xf32>
    "tpu.trace_start"() <{level = 10 : i32, message = "ble,bek->blk"}> : () -> ()
    %cst_19 = arith.constant dense<0.000000e+00> : vector<2x14x16xf32>
    %21 = tpu.matmul %16, %20, %cst_19 {dimension_numbers = #tpu.dot_dimension_numbers<[2], [1], [1], [2], [0, 0, 0, 1, 1, 2], [0], [0]>} : vector<2x14x16xf32>, vector<2x16x16xf32>, vector<2x14x16xf32> -> vector<2x14x16xf32>
    "tpu.trace_stop"() : () -> ()
    %22 = arith.addf %15, %21 : vector<2x14x16xf32>
    %c0_20 = arith.constant 0 : index
    %c2 = arith.constant 2 : index
    %c0_21 = arith.constant 0 : index
    %23 = vector.load %arg0[%c0_20, %c2, %c0_21] : memref<2x16x16xf32, #tpu.memory_space<vmem>>, vector<2x14x16xf32>
    %c2_22 = arith.constant 2 : index
    %c0_23 = arith.constant 0 : index
    %c0_24 = arith.constant 0 : index
    %24 = vector.load %arg1[%c2_22, %c0_23, %c0_24] : memref<3x16x16xf32, #tpu.memory_space<vmem>>, vector<1x16x16xf32>
    %25 = vector.shape_cast %24 : vector<1x16x16xf32> to vector<16x16xf32>
    %26 = vector.shape_cast %25 : vector<16x16xf32> to vector<1x16x16xf32>
    %27 = vector.broadcast %26 : vector<1x16x16xf32> to vector<2x16x16xf32>
    "tpu.trace_start"() <{level = 10 : i32, message = "ble,bek->blk"}> : () -> ()
    %cst_25 = arith.constant dense<0.000000e+00> : vector<2x14x16xf32>
    %28 = tpu.matmul %23, %27, %cst_25 {dimension_numbers = #tpu.dot_dimension_numbers<[2], [1], [1], [2], [0, 0, 0, 1, 1, 2], [0], [0]>} : vector<2x14x16xf32>, vector<2x16x16xf32>, vector<2x14x16xf32> -> vector<2x14x16xf32>
    "tpu.trace_stop"() : () -> ()
    %29 = arith.addf %22, %28 : vector<2x14x16xf32>
    %30 = vector.shape_cast %0 : vector<1x16xf32> to vector<1x1x16xf32>
    %31 = vector.broadcast %30 : vector<1x1x16xf32> to vector<2x14x16xf32>
    %32 = arith.addf %29, %31 : vector<2x14x16xf32>
    %cst_26 = arith.constant 0.000000e+00 : f32
    %33 = vector.broadcast %cst_26 : f32 to vector<2x14x16xf32>
    %34 = arith.maximumf %32, %33 : vector<2x14x16xf32>
    "tpu.trace_start"() <{level = 10 : i32, message = "bnk,blk->bnl"}> : () -> ()
    %cst_27 = arith.constant dense<0.000000e+00> : vector<2x8x14xf32>
    %35 = tpu.matmul %3, %34, %cst_27 {dimension_numbers = #tpu.dot_dimension_numbers<[2], [2], [1], [1], [0, 0, 0, 1, 1, 1], [0], [0]>} : vector<2x8x16xf32>, vector<2x14x16xf32>, vector<2x8x14xf32> -> vector<2x8x14xf32>
    "tpu.trace_stop"() : () -> ()
    %cst_28 = arith.constant dense<0xFF800000> : vector<2x8xf32>
    %36 = vector.multi_reduction <maximumf>, %35, %cst_28 [2] : vector<2x8x14xf32> to vector<2x8xf32>
    %37 = vector.shape_cast %36 : vector<2x8xf32> to vector<2x8x1xf32>
    %38 = vector.broadcast %37 : vector<2x8x1xf32> to vector<2x8x14xf32>
    %39 = arith.subf %35, %38 : vector<2x8x14xf32>
    %40 = math.exp %39 : vector<2x8x14xf32>
    %cst_29 = arith.constant dense<0.000000e+00> : vector<2x8xf32>
    %41 = vector.multi_reduction <add>, %40, %cst_29 [2] : vector<2x8x14xf32> to vector<2x8xf32>
    %42 = vector.shape_cast %41 : vector<2x8xf32> to vector<2x8x1xf32>
    %43 = vector.broadcast %42 : vector<2x8x1xf32> to vector<2x8x14xf32>
    %44 = arith.divf %40, %43 : vector<2x8x14xf32>
    "tpu.trace_start"() <{level = 10 : i32, message = "bnl,blk->bnk"}> : () -> ()
    %cst_30 = arith.constant dense<0.000000e+00> : vector<2x8x16xf32>
    %45 = tpu.matmul %44, %34, %cst_30 {dimension_numbers = #tpu.dot_dimension_numbers<[2], [1], [1], [2], [0, 0, 0, 1, 1, 2], [0], [0]>} : vector<2x8x14xf32>, vector<2x14x16xf32>, vector<2x8x16xf32> -> vector<2x8x16xf32>
    "tpu.trace_stop"() : () -> ()
    "tpu.trace_start"() <{level = 10 : i32, message = "bnk,bkf->bnf"}> : () -> ()
    %cst_31 = arith.constant dense<0.000000e+00> : vector<2x8x32xf32>
    %46 = tpu.matmul %45, %6, %cst_31 {dimension_numbers = #tpu.dot_dimension_numbers<[2], [1], [1], [2], [0, 0, 0, 1, 1, 2], [0], [0]>} : vector<2x8x16xf32>, vector<2x16x32xf32>, vector<2x8x32xf32> -> vector<2x8x32xf32>
    "tpu.trace_stop"() : () -> ()
    %47 = vector.shape_cast %7 : vector<1x32xf32> to vector<1x1x32xf32>
    %48 = vector.broadcast %47 : vector<1x1x32xf32> to vector<2x8x32xf32>
    %49 = arith.addf %46, %48 : vector<2x8x32xf32>
    %50 = math.tanh %49 : vector<2x8x32xf32>
    %c0_32 = arith.constant 0 : index
    %c0_33 = arith.constant 0 : index
    %c0_34 = arith.constant 0 : index
    %51 = vector.load %arg6[%c0_32, %c0_33, %c0_34] : memref<2x8x32xf32, #tpu.memory_space<vmem>>, vector<2x8x32xf32>
    tpu.vector_store %arg6[%c0_32, %c0_33, %c0_34], %50 {strides = array<i32>} : memref<2x8x32xf32, #tpu.memory_space<vmem>>, vector<2x8x32xf32>,
    return
  }
}

</mosaic_0001>

<bundles_post_ra>
// kernel: tpu_custom_call.1
= control target key start
LH: loop header
LB: loop body
LE: loop exit
PB: predicated region body
PF: predicated region fallthrough
CT: control target
= control target key end

     0   :  { %11 = vsyncpa [#allocation3], 0  ;;  %s1711_s0 = inlined_call_operand.hbm [shape: f32[2,16,16], index: 0, kind: input, shape index: {}]   ;;  %s1712_s1 = inlined_call_operand.hbm [shape: f32[3,16,16], index: 1, kind: input, shape index: {}]   ;;  %s1713_s2 = inlined_call_operand.hbm [shape: f32[1,16], index: 2, kind: input, shape index: {}]   ;;  %s1714_s3 = inlined_call_operand.hbm [shape: f32[8,16], index: 3, kind: input, shape index: {}]   ;;  %s1715_s4 = inlined_call_operand.hbm [shape: f32[16,32], index: 4, kind: input, shape index: {}]   ;;  %s1716_s5 = inlined_call_operand.hbm [shape: f32[1,32], index: 5, kind: input, shape index: {}]   ;;  %s1717_s6 = inlined_call_operand.hbm [shape: f32[2,8,32], index: 6, kind: output, shape index: {}]  }
   0x1   :  { %12 = vsyncpa [#allocation6], 0 }
   0x2   :  { %13 = vsyncpa [#allocation9], 0 }
   0x3   :  { %14 = vsyncpa [#allocation12], 0 }
   0x4   :  { %15 = vsyncpa [#allocation4], 0  ;;  %s1531_s21 = smov [#allocation5]   ;;  %s1532_s23 = smov [#allocation8]  }
   0x5   :  { %s33_s22 = sshll.u32 %s1531_s21, 4  ;;  %s56_s24 = sshll.u32 %s1532_s23, 4  ;;  %s34_s22 = int_to_ptr.vmem [resolvable:$true] %s33_s22  ;;  %s57_s24 = int_to_ptr.vmem [resolvable:$true] %s56_s24 }
   0x6   :  { %s1367_s27 = scalar_lea.hbm %s1712_s1, 768 }
   0x7   :  { %p1368_p0 = scmp.ne.s32.totalorder %s1712_s1, %s1367_s27  ;;  %p1371_p1 = scmp.lt.u32.totalorder %s1367_s27, %s1712_s1 }
   0x9   :  { %p1373_p2 = pnand %p1371_p1, %p1368_p0 }
   0xb   :  { %1376 = shalt.err (!%p1373_p2)
}
   0xc   :  { %s1377_s8 = scalar_lea.vmem %s34_s22, 768  ;;  %p1382_p4 = scmp.lt.s32.totalorder %s34_s22, %s34_s22 }
   0xd   :  { %p1378_p3 = scmp.ne.s32.totalorder %s34_s22, %s1377_s8  ;;  %p1383_p5 = scmp.lt.s32.totalorder %s1377_s8, %s1377_s8 }
   0xf   :  { %p1384_p6 = por %p1383_p5, %p1382_p4 }
  0x11   :  { %p1385_p7 = pnand %p1384_p6, %p1378_p3 }
  0x13   :  { %1388 = shalt.err (!%p1385_p7)
}
  0x14   :  { %s1533_s9 = smov 128   ;;  %s1534_s10 = smov 8  }
  0x15   :  { %39 = dma.hbm_to_vmem [thread:$0]  %s1712_s1, 768, %s34_s22, [#allocation6], %s1533_s9, %s1533_s9, %s1534_s10  }
  0x16   :  { %s1389_s15 = scalar_lea.hbm %s1714_s3, 128 }
  0x17   :  { %p1390_p8 = scmp.ne.s32.totalorder %s1714_s3, %s1389_s15  ;;  %p1393_p9 = scmp.lt.u32.totalorder %s1389_s15, %s1714_s3 }
  0x19   :  { %p1395_p10 = pnand %p1393_p9, %p1390_p8 }
  0x1b   :  { %1398 = shalt.err (!%p1395_p10)
}
  0x1c   :  { %s1399_s20 = scalar_lea.vmem %s57_s24, 128  ;;  %p1404_p12 = scmp.lt.s32.totalorder %s57_s24, %s57_s24 }
  0x1d   :  { %p1400_p11 = scmp.ne.s32.totalorder %s57_s24, %s1399_s20  ;;  %p1405_p13 = scmp.lt.s32.totalorder %s1399_s20, %s1399_s20 }
  0x1f   :  { %p1406_p0 = por %p1405_p13, %p1404_p12 }
  0x21   :  { %p1407_p1 = pnand %p1406_p0, %p1400_p11 }
  0x23   :  { %1410 = shalt.err (!%p1407_p1)
}
  0x24   :  { %59 = dma.hbm_to_vmem [thread:$0]  %s1714_s3, 128, %s57_s24, [#allocation9]  }
  0x25   :  { %s1535_s22 = smov [#allocation2]   ;;  %s1536_s25 = smov [#allocation7]  }
  0x26   :  { %s21_s23 = sshll.u32 %s1535_s22, 4  ;;  %s46_s26 = sshll.u32 %s1536_s25, 4  ;;  %s22_s23 = int_to_ptr.vmem [resolvable:$true] %s21_s23  ;;  %s47_s26 = int_to_ptr.vmem [resolvable:$true] %s46_s26 }
  0x27   :  { %s1411_s29 = scalar_lea.hbm %s1711_s0, 512 }
  0x28   :  { %p1412_p2 = scmp.ne.s32.totalorder %s1711_s0, %s1411_s29  ;;  %p1415_p3 = scmp.lt.u32.totalorder %s1411_s29, %s1711_s0 }
  0x2a   :  { %p1417_p4 = pnand %p1415_p3, %p1412_p2 }
  0x2c   :  { %1420 = shalt.err (!%p1417_p4)
}
  0x2d   :  { %s1421_s3 = scalar_lea.vmem %s22_s23, 512  ;;  %p1426_p6 = scmp.lt.s32.totalorder %s22_s23, %s22_s23 }
  0x2e   :  { %p1422_p5 = scmp.ne.s32.totalorder %s22_s23, %s1421_s3  ;;  %p1427_p7 = scmp.lt.s32.totalorder %s1421_s3, %s1421_s3 }
  0x30   :  { %p1428_p8 = por %p1427_p7, %p1426_p6 }
  0x32   :  { %p1429_p9 = pnand %p1428_p8, %p1422_p5 }
  0x34   :  { %1432 = shalt.err (!%p1429_p9)
}
  0x35   :  { %27 = dma.hbm_to_vmem [thread:$0]  %s1711_s0, 512, %s22_s23, [#allocation3], %s1533_s9, %s1533_s9, %s1534_s10  }
  0x36   :  { %s1433_s15 = scalar_lea.hbm %s1713_s2, 16 }
  0x37   :  { %p1434_p10 = scmp.ne.s32.totalorder %s1713_s2, %s1433_s15  ;;  %p1437_p11 = scmp.lt.u32.totalorder %s1433_s15, %s1713_s2 }
  0x39   :  { %p1439_p12 = pnand %p1437_p11, %p1434_p10 }
  0x3b   :  { %1442 = shalt.err (!%p1439_p12)
}
  0x3c   :  { %s1443_s20 = scalar_lea.vmem %s47_s26, 16  ;;  %s1447_s1 = scalar_lea.vmem %s47_s26, 32 }
  0x3d   :  { %p1444_p13 = scmp.ne.s32.totalorder %s47_s26, %s1443_s20  ;;  %p1448_p0 = scmp.lt.s32.totalorder %s47_s26, %s47_s26 }
  0x3e   :  { %p1449_p1 = scmp.lt.s32.totalorder %s1447_s1, %s1443_s20 }
  0x40   :  { %p1450_p2 = por %p1449_p1, %p1448_p0 }
  0x42   :  { %p1451_p3 = pnand %p1450_p2, %p1444_p13 }
  0x44   :  { %1454 = shalt.err (!%p1451_p3)
}
  0x45   :  { %49 = dma.hbm_to_vmem [thread:$0]  %s1713_s2, 16, %s47_s26, [#allocation6]  }
  0x46   :  { %s1537_s22 = smov [#allocation10]   ;;  %s1538_s25 = smov [#allocation11]  }
  0x47   :  { %s65_s23 = sshll.u32 %s1537_s22, 4  ;;  %s78_s27 = sshll.u32 %s1538_s25, 4  ;;  %s66_s23 = int_to_ptr.vmem [resolvable:$true] %s65_s23  ;;  %s79_s27 = int_to_ptr.vmem [resolvable:$true] %s78_s27 }
  0x48   :  { %s1455_s30 = scalar_lea.hbm %s1715_s4, 256 }
  0x49   :  { %p1456_p4 = scmp.ne.s32.totalorder %s1715_s4, %s1455_s30  ;;  %p1459_p5 = scmp.lt.u32.totalorder %s1455_s30, %s1715_s4 }
  0x4b   :  { %p1461_p6 = pnand %p1459_p5, %p1456_p4 }
  0x4d   :  { %1464 = shalt.err (!%p1461_p6)
}
  0x4e   :  { %s1465_s2 = scalar_lea.vmem %s66_s23, 256  ;;  %p1470_p8 = scmp.lt.s32.totalorder %s66_s23, %s66_s23 }
  0x4f   :  { %p1466_p7 = scmp.ne.s32.totalorder %s66_s23, %s1465_s2  ;;  %p1471_p9 = scmp.lt.s32.totalorder %s1465_s2, %s1465_s2 }
  0x51   :  { %p1472_p10 = por %p1471_p9, %p1470_p8 }
  0x53   :  { %p1473_p11 = pnand %p1472_p10, %p1466_p7 }
  0x55   :  { %1476 = shalt.err (!%p1473_p11)
}
  0x56   :  { %71 = dma.hbm_to_vmem [thread:$0]  %s1715_s4, 256, %s66_s23, [#allocation9], %s1533_s9, %s1533_s9, %s1534_s10  }
  0x57   :  { %s1477_s14 = scalar_lea.hbm %s1716_s5, 16 }
  0x58   :  { %p1478_p12 = scmp.ne.s32.totalorder %s1716_s5, %s1477_s14  ;;  %p1481_p13 = scmp.lt.u32.totalorder %s1477_s14, %s1716_s5 }
  0x5a   :  { %p1483_p0 = pnand %p1481_p13, %p1478_p12 }
  0x5c   :  { %1486 = shalt.err (!%p1483_p0)
}
  0x5d   :  { %s1487_s19 = scalar_lea.vmem %s79_s27, 16  ;;  %s1491_s20 = scalar_lea.vmem %s79_s27, 32 }
  0x5e   :  { %p1488_p1 = scmp.ne.s32.totalorder %s79_s27, %s1487_s19  ;;  %p1492_p2 = scmp.lt.s32.totalorder %s79_s27, %s79_s27 }
  0x5f   :  { %p1493_p3 = scmp.lt.s32.totalorder %s1491_s20, %s1487_s19 }
  0x61   :  { %p1494_p4 = por %p1493_p3, %p1492_p2 }
  0x63   :  { %p1495_p5 = pnand %p1494_p4, %p1488_p1 }
  0x65   :  { %1498 = shalt.err (!%p1495_p5)
}
  0x66   :  { %81 = dma.hbm_to_vmem [thread:$0]  %s1716_s5, 16, %s79_s27, [#allocation12]  }
  0x67   :  { %1521 = dma.done.wait [#allocation3], 512  }
  0x68   :  { %1522 = vsyncadd [#allocation3], 4294966784 }
  0x69   :  { %1523 = dma.done.wait [#allocation6], 784  }
  0x6a   :  { %1524 = vsyncadd [#allocation6], 4294966512 }
  0x6b   :  { %1525 = dma.done.wait [#allocation9], 384  }
  0x6c   :  { %1526 = vsyncadd [#allocation9], 4294966912 }
  0x6d   :  { %1527 = dma.done.wait [#allocation12], 16  }
  0x6e   :  { %1528 = vsyncadd [#allocation12], 4294967280  ;;  %vm118_vm0 = vcmask 130048   ;;  %v116_v0 = vld [vmem:[#allocation5 + $0x10] sm:$0xff]  ;;  %v117_v1 = vld [vmem:[#allocation5 + $0x18] sm:$0xff]  ;;  %v1539_v21 = vmov 0.0|0.0  }
  0x6f   :  { %v111_v2 = vld [vmem:[#allocation2 + $0x1] sm:$0xff]  ;;  %v1288_v3 = vpack.c.bf16 %v117_v1, %v116_v0  ;;  %v113_v4 = vld [vmem:[#allocation2 + $0x11] sm:$0xff]  ;;  %v112_v7 = vld [vmem:[#allocation2 + $0x9] sm:$0x3f]  ;;  %vm1540_vm1 = vmmov 0   ;;  %v1541_v22 = vmov 0.0  }
  0x70   :  { %1208 = vmatprep.mubr.msk.f32.mxu0 %vm118_vm0, %v111_v2  ;;  %1215 = vmatprep.mubr.msk.f32.mxu1 %vm118_vm0, %v113_v4  ;;  %v109_v5 = vld [vmem:[#allocation5] sm:$0xff]  ;;  %v110_v6 = vld [vmem:[#allocation5 + $0x8] sm:$0xff]  ;;  %v114_v9 = vld [vmem:[#allocation2 + $0x19] sm:$0x3f]  ;;  %vm811_vm3 = vcmask 1045504   ;;  %vm1542_vm4 = vmmov 1  }
  0x71   :  { %1289 = vmatprep.subr.bf16.mxu0 %v1288_v3  ;;  %1293 = vmatprep.subr.bf16.mxu1 %v1288_v3  ;;  %v1296_v8 = vpack.c.bf16 %v110_v6, %v109_v5  ;;  %v448_v10 = vld [vmem:[#allocation5 + $0x20] sm:$0xff]  ;;  %v449_v11 = vld [vmem:[#allocation5 + $0x28] sm:$0xff]  ;;  %v107_v13 = vld [vmem:[#allocation2 + $0x10] sm:$0xff]  ;;  %vm785_vm6 = vcmask 113664   ;;  %vm1113_vm7 = vcmask 261120   ;;  %s1543_s5 = smov [#allocation13]  }
  0x72   :  { %1291 = vmatpush3.bf16.msra.mxu0 %v1288_v3  ;;  %1295 = vmatpush3.bf16.msra.mxu1 %v1288_v3  ;;  %v105_v12 = vld [vmem:[#allocation2] sm:$0xff]  ;;  %v1304_v14 = vpack.c.bf16 %v449_v11, %v448_v10  ;;  %v106_v15 = vld [vmem:[#allocation2 + $0x8] sm:$0x3f]  ;;  %v108_v16 = vld [vmem:[#allocation2 + $0x18] sm:$0x3f]  ;;  %s1121_s0 = sshll.u32 %s1543_s5, 4  ;;  %s1122_s0 = int_to_ptr.vmem [resolvable:$true] %s1121_s0 }
  0x73   :  { %1297 = vmatprep.subr.bf16.mxu0 %v1296_v8  ;;  %1301 = vmatprep.subr.bf16.mxu1 %v1296_v8  ;;  %v443_v17 = vld [vmem:[#allocation2 + $0x2] sm:$0xff]  ;;  %v445_v18 = vld [vmem:[#allocation2 + $0x12] sm:$0xff]  ;;  %v444_v19 = vld [vmem:[#allocation2 + $0xa] sm:$0x3f]  ;;  %s1499_s21 = scalar_lea.vmem %s1122_s0, 256  ;;  %p1504_p7 = scmp.lt.s32.totalorder %s1122_s0, %s1122_s0 }
  0x74   :  { %v446_v20 = vld [vmem:[#allocation2 + $0x1a] sm:$0x3f]  ;;  %v1148_v23 = vld [vmem:[#allocation7] ss:$0 sm:$0xff]  ;;  %vm1314_vm2 = vmpackc.low %vm118_vm0, %vm118_vm0  ;;  %p1500_p6 = scmp.ne.s32.totalorder %s1122_s0, %s1499_s21  ;;  %p1505_p8 = scmp.lt.s32.totalorder %s1499_s21, %s1499_s21 }
  0x75   :  { %1209 = vmatmul.mubr.msk.f32.vlgmr.msra.gmra.mrb[0].mxu0 %vm118_vm0, %v112_v7  ;;  %1216 = vmatmul.mubr.msk.f32.vlgmr.msra.gmra.mrb[0].mxu1 %vm118_vm0, %v114_v9  ;;  %v101_v38 = vld [vmem:[#allocation8] sm:$0xff]  ;;  %vm1322_vm5 = vmpackc.low %vm811_vm3, %vm1542_vm4  ;;  %v102_v57 = vld [vmem:[#allocation10] sm:$0xff] }
  0x76   :  { %1299 = vmatpush3.bf16.msra.mxu0 %v1296_v8  ;;  %1303 = vmatpush3.bf16.msra.mxu1 %v1296_v8  ;;  %v103_v58 = vld [vmem:[#allocation10 + $0x8] sm:$0xff]  ;;  %v1159_v4 = vld [vmem:[#allocation11] ss:$0 sm:$0xff]  ;;  %p1506_p9 = por %p1505_p8, %p1504_p7 }
  0x77   :  { %1222 = vmatprep.mubr.msk.f32.mxu0 %vm118_vm0, %v105_v12  ;;  %1229 = vmatprep.mubr.msk.f32.mxu1 %vm118_vm0, %v107_v13  ;;  %v1329_v60 = vpack.c.bf16 %v103_v58, %v102_v57 }
  0x78   :  { %1305 = vmatprep.subr.bf16.mxu0 %v1304_v14  ;;  %1309 = vmatprep.subr.bf16.mxu1 %v1304_v14  ;;  %p1507_p10 = pnand %p1506_p9, %p1500_p6 }
  0x7d   :  { %1223 = vmatmul.mubr.msk.f32.vlgmr.msra.gmra.mrb[0].mxu0 %vm118_vm0, %v106_v15  ;;  %1230 = vmatmul.mubr.msk.f32.vlgmr.msra.gmra.mrb[0].mxu1 %vm118_vm0, %v108_v16 }
  0x7e   :  { %1307 = vmatpush3.bf16.msra.mxu0 %v1304_v14  ;;  %1311 = vmatpush3.bf16.msra.mxu1 %v1304_v14 }
  0x7f   :  { %1236 = vmatprep.mubr.msk.f32.mxu0 %vm118_vm0, %v443_v17  ;;  %1243 = vmatprep.mubr.msk.f32.mxu1 %vm118_vm0, %v445_v18 }
  0x80   :  { %1312 = vmatprep.subr.bf16.mxu0 %v1539_v21  ;;  %1316 = vmatprep.subr.bf16.mxu1 %v1539_v21 }
  0x85   :  { %1237 = vmatmul.mubr.msk.f32.vlgmr.msra.gmra.mrb[0].mxu0 %vm118_vm0, %v444_v19  ;;  %1244 = vmatmul.mubr.msk.f32.vlgmr.msra.gmra.mrb[0].mxu1 %vm118_vm0, %v446_v20 }
  0x86   :  { %1250 = vmatprep.mubr.msk.f32.mxu0 %vm1540_vm1, %v1541_v22  ;;  %1257 = vmatprep.mubr.msk.f32.mxu1 %vm1540_vm1, %v1541_v22 }
 0x158   :  { %v1238_v24 = vpop.f32.mrb[0].mxu0  ;;  %v1245_v25 = vpop.f32.mrb[0].mxu1 }
 0x159   :  { %v623_v26 = vadd.f32 %v1238_v24, %v1148_v23  ;;  %v625_v27 = vadd.f32 %v1245_v25, %v1148_v23  ;;  %v522_v28 = vpop.f32.mrb[1].mxu0  ;;  %v603_v29 = vpop.f32.mrb[1].mxu1 }
 0x15a   :  { %v622_v30 = vadd.f32 %v1148_v23, %v522_v28  ;;  %v624_v31 = vadd.f32 %v1148_v23, %v603_v29 }
 0x15b   :  { %v627_v32 = vmax.f32 %v623_v26, 0.0  ;;  %v629_v33 = vmax.f32 %v625_v27, 0.0 }
 0x15c   :  { %v626_v34 = vmax.f32 %v622_v30, 0.0  ;;  %v628_v35 = vmax.f32 %v624_v31, 0.0 }
 0x15e   :  { %v1313_v36 = vpack.c.bf16 %v627_v32, %v626_v34  ;;  %v1317_v37 = vpack.c.bf16 %v629_v33, %v628_v35 }
 0x160   :  { %1315 = vmatpush3.bf16.xpose.msk.msra.mxu0 %vm1314_vm2, %v1313_v36  ;;  %1319 = vmatpush3.bf16.xpose.msk.msra.mxu1 %vm1314_vm2, %v1317_v37 }
 0x161   :  { %1320 = vmatprep.subr.bf16.mxu0 %v1539_v21  ;;  %1324 = vmatprep.subr.bf16.mxu1 %v1539_v21 }
 0x167   :  { %1251 = vmatmul.mubr.msk.f32.vlgmr.msra.gmra.mrb[2].mxu0 %vm118_vm0, %v101_v38  ;;  %1258 = vmatmul.mubr.msk.f32.vlgmr.msra.gmra.mrb[2].mxu1 %vm118_vm0, %v101_v38 }
 0x168   :  { %1323 = vmatpush3.bf16.msk.msra.mxu0 %vm1322_vm5, %v1313_v36  ;;  %1327 = vmatpush3.bf16.msk.msra.mxu1 %vm1322_vm5, %v1317_v37 }
 0x169   :  { %1264 = vmatprep.mubr.msk.f32.mxu0 %vm1540_vm1, %v1541_v22  ;;  %1271 = vmatprep.mubr.msk.f32.mxu1 %vm1540_vm1, %v1541_v22 }
 0x16a   :  { %1328 = vmatprep.subr.bf16.mxu0 %v1539_v21  ;;  %1331 = vmatprep.subr.bf16.mxu1 %v1539_v21 }
 0x23a   :  { %v705_v39 = vpop.f32.mrb[2].mxu0  ;;  %v781_v40 = vpop.f32.mrb[2].mxu1 }
 0x23b   :  { %v1252_v41 = vpop.f32.mrb[3].mxu0  ;;  %v786_v42 = vsel %vm785_vm6, %v705_v39, -inf  ;;  %v1259_v43 = vpop.f32.mrb[3].mxu1  ;;  %v789_v44 = vsel %vm785_vm6, %v781_v40, -inf }
 0x23c   :  { %787 = vmax.xlane.f32.xlu0 %v786_v42 }
 0x240   :  { %790 = vmax.xlane.f32.xlu0 %v789_v44 }
 0x2c9   :  { %v788_v45 = vpop.xlane.xlu0 %787 }
 0x2ca   :  { %v792_v46 = vsub.f32 %v705_v39, %v788_v45 }
 0x2cc   :  { %v794_v47 = vmul.f32 1.442695, %v792_v46 }
 0x2cd   :  { %v791_v48 = vpop.xlane.xlu0 %790 }
 0x2ce   :  { %1355 = vpow2.f32 %v794_v47  ;;  %v793_v49 = vsub.f32 %v781_v40, %v791_v48 }
 0x2d0   :  { %v796_v50 = vmul.f32 1.442695, %v793_v49 }
 0x2d2   :  { %1357 = vpow2.f32 %v796_v50 }
 0x2d8   :  { %v1356_v51 = vpop.eup %1355 }
 0x2d9   :  { %v798_v52 = vsel %vm785_vm6, %v1356_v51, 0.0 }
 0x2da   :  { %799 = vadd.xlane.f32.xlu1 %v798_v52 }
 0x2dc   :  { %v1358_v53 = vpop.eup %1357 }
 0x2dd   :  { %v801_v54 = vsel %vm785_vm6, %v1358_v53, 0.0 }
 0x2de   :  { %802 = vadd.xlane.f32.xlu1 %v801_v54 }
 0x367   :  { %v800_v55 = vpop.xlane.xlu1 %799 }
 0x368   :  { %1359 = vrcp.f32 %v800_v55 }
 0x36b   :  { %v803_v56 = vpop.xlane.xlu1 %802 }
 0x36c   :  { %1361 = vrcp.f32 %v803_v56 }
 0x372   :  { %v1360_v59 = vpop.eup %1359 }
 0x373   :  { %v805_v61 = vmul.f32 %v1360_v59, %v1356_v51 }
 0x375   :  { %1265 = vmatmul.mubr.msk.f32.vlgmr.msra.gmra.mrb[4].mxu0 %vm785_vm6, %v805_v61 }
 0x376   :  { %v1362_v62 = vpop.eup %1361  ;;  %1330 = vmatpush3.bf16.msra.mxu0 %v1329_v60  ;;  %1278 = vmatprep.mubr.msk.f32.mxu0 %vm1540_vm1, %v1541_v22 }
 0x377   :  { %v807_v63 = vmul.f32 %v1362_v62, %v1358_v53 }
 0x379   :  { %1272 = vmatmul.mubr.msk.f32.vlgmr.msra.gmra.mrb[4].mxu1 %vm785_vm6, %v807_v63 }
 0x37a   :  { %1333 = vmatpush3.bf16.msra.mxu1 %v1329_v60  ;;  %1285 = vmatprep.mubr.msk.f32.mxu1 %vm1540_vm1, %v1541_v22 }
 0x448   :  { %v880_v0 = vpop.f32.mrb[4].mxu0 }
 0x449   :  { %v1266_v1 = vpop.f32.mrb[5].mxu0  ;;  %1279 = vmatmul.mubr.msk.f32.vlgmr.msra.gmra.mrb[6].mxu0 %vm118_vm0, %v880_v0 }
 0x44c   :  { %v955_v2 = vpop.f32.mrb[4].mxu1 }
 0x44d   :  { %v1273_v3 = vpop.f32.mrb[5].mxu1  ;;  %1286 = vmatmul.mubr.msk.f32.vlgmr.msra.gmra.mrb[6].mxu1 %vm118_vm0, %v955_v2 }
 0x51c   :  { %v1034_v5 = vpop.f32.mrb[6].mxu0 }
 0x51d   :  { %v1035_v6 = vadd.f32 %v1159_v4, %v1034_v5  ;;  %v1280_v7 = vpop.f32.mrb[7].mxu0 }
 0x51f   :  { %1363 = vtanh.f32 %v1035_v6 }
 0x520   :  { %v1107_v8 = vpop.f32.mrb[6].mxu1 }
 0x521   :  { %v1108_v9 = vadd.f32 %v1159_v4, %v1107_v8  ;;  %v1287_v10 = vpop.f32.mrb[7].mxu1 }
 0x523   :  { %1365 = vtanh.f32 %v1108_v9 }
 0x529   :  { %v1364_v11 = vpop.eup %1363 }
 0x52a   :  { %1114 = vst.msk [vmem:[#allocation13] sm:$0xff] %vm1113_vm7, %v1364_v11 }
 0x52d   :  { %v1366_v12 = vpop.eup %1365 }
 0x52e   :  { %1115 = vst.msk [vmem:[#allocation13 + $0x8] sm:$0xff] %vm1113_vm7, %v1366_v12 }
 0x52f   :  { %1510 = shalt.err (!%p1507_p10)
}
 0x530   :  { %s1511_s25 = scalar_lea.hbm %s1717_s6, 256 }
 0x531   :  { %p1512_p11 = scmp.ne.s32.totalorder %s1717_s6, %s1511_s25  ;;  %p1515_p12 = scmp.lt.u32.totalorder %s1511_s25, %s1717_s6 }
 0x533   :  { %p1517_p13 = pnand %p1515_p12, %p1512_p11 }
 0x535   :  { %1520 = shalt.err (!%p1517_p13)
}
 0x536   :  { %1127 = dma.vmem_to_hbm [thread:$0]  %s1122_s0, 256, %s1717_s6, [#allocation4], %s1533_s9, %s1533_s9, %s1534_s10  }
 0x537   :  { %1529 = dma.done.wait [#allocation4], 256  }
 0x538   :  { %1530 = vsyncadd [#allocation4], 4294967040 }
 0x539   :  { %1131 = vsyncpa [#allocation3], 1 }
 0x53a   :  { %1132 = vsyncpa [#allocation6], 1 }
 0x53b   :  { %1133 = vsyncpa [#allocation9], 1 }
 0x53c   :  { %1134 = vsyncpa [#allocation12], 1 }
 0x53d   :  { %1135 = vsyncpa [#allocation4], 1 }

</bundles_post_ra>
